<compile_context>
chip_gen: v5e
topology: v5e:2x2
jax: 0.10.0
libtpu: 0.0.40
codegen_flags: <defaults>
</compile_context>

<pallas_src>
import functools

import jax
import jax.numpy as jnp
from jax.experimental import pallas as pl
from jax.experimental.pallas import tpu as pltpu


# ----------------------------- Pallas kernels --------------------------------

def _fused_kernel(x_ref, w_ref, b_ref, o_ref):
    """blocks = clip(x @ w + b, -1, 1): whole net folded into one matmul."""
    y = jnp.dot(x_ref[...], w_ref[...], preferred_element_type=jnp.float32)
    y = y + b_ref[...]
    o_ref[...] = jnp.clip(y, -1.0, 1.0).astype(o_ref.dtype)


def _fused_feat_kernel(x_ref, we_ref, be_ref, wd_ref, bd_ref, feat_ref, o_ref):
    """feat = x @ w_enc + b_enc ; blocks = clip(feat @ w_dec + b_dec, -1, 1).

    Both outputs come from one kernel, so feat never round-trips through HBM
    between two pallas_calls."""
    feat = jnp.dot(x_ref[...], we_ref[...], preferred_element_type=jnp.float32)
    feat = feat + be_ref[...]
    feat_ref[...] = feat.astype(feat_ref.dtype)
    y = jnp.dot(feat.astype(wd_ref.dtype), wd_ref[...],
                preferred_element_type=jnp.float32)
    y = y + bd_ref[...]
    o_ref[...] = jnp.clip(y, -1.0, 1.0).astype(o_ref.dtype)


# ------------------------------ tiling helpers --------------------------------

_VMEM_LIMIT = 32 * 1024 * 1024  # fits v5e physical / v6e scoped / v7x physical


def _row_tile(m, tm_cap):
    """Row tile: multiple of 8, capped, and (when possible) >= 2 grid blocks so
    the 'parallel' axis shards across the two v7x TensorCores."""
    if m <= 8:
        return m                      # full-extent block, no (8,128) issue
    half = -(-m // 2)                 # ceil(m / 2)
    tm = -(-half // 8) * 8            # round up to a multiple of 8
    return min(tm_cap, tm)


def _call_fused(patches, w_full, b_full, *, tm_cap=4096):
    """blocks = clip(patches @ w_full + b_full, -1, 1), tiled over rows only."""
    m, k = patches.shape
    n = w_full.shape[1]
    tm = _row_tile(m, tm_cap)
    grid_m = pl.cdiv(m, tm)
    cost = pl.CostEstimate(
        flops=2 * m * k * n,
        transcendentals=0,
        bytes_accessed=(m * k * patches.dtype.itemsize
                        + m * n * 4
                        + k * n * w_full.dtype.itemsize + n * 4))
    return pl.pallas_call(
        _fused_kernel,
        out_shape=jax.ShapeDtypeStruct((m, n), jnp.float32),
        grid_spec=pltpu.PrefetchScalarGridSpec(
            num_scalar_prefetch=0,
            grid=(grid_m,),
            in_specs=[
                pl.BlockSpec((tm, k), lambda i: (i, 0)),
                pl.BlockSpec((k, n), lambda i: (0, 0)),
                pl.BlockSpec((1, n), lambda i: (0, 0)),
            ],
            out_specs=pl.BlockSpec((tm, n), lambda i: (i, 0)),
        ),
        compiler_params=pltpu.CompilerParams(
            dimension_semantics=("parallel",),
            vmem_limit_bytes=_VMEM_LIMIT),
        cost_estimate=cost,
    )(patches, w_full, b_full.reshape(1, n))


def _call_fused_feat(patches, w_enc, b_enc, w_dec, b_dec, *, tm_cap=4096):
    """One pallas_call, two outputs: (feat = x@w_enc+b_enc, blocks = clipped)."""
    m, k = patches.shape
    f = w_enc.shape[1]
    n = w_dec.shape[1]
    tm = _row_tile(m, tm_cap)
    grid_m = pl.cdiv(m, tm)
    cost = pl.CostEstimate(
        flops=2 * m * k * f + 2 * m * f * n,
        transcendentals=0,
        bytes_accessed=(m * k * patches.dtype.itemsize
                        + m * f * 4 + m * n * 4
                        + k * f * w_enc.dtype.itemsize
                        + f * n * w_dec.dtype.itemsize + f * 4 + n * 4))
    return pl.pallas_call(
        _fused_feat_kernel,
        out_shape=(jax.ShapeDtypeStruct((m, f), jnp.float32),
                   jax.ShapeDtypeStruct((m, n), jnp.float32)),
        grid_spec=pltpu.PrefetchScalarGridSpec(
            num_scalar_prefetch=0,
            grid=(grid_m,),
            in_specs=[
                pl.BlockSpec((tm, k), lambda i: (i, 0)),
                pl.BlockSpec((k, f), lambda i: (0, 0)),
                pl.BlockSpec((1, f), lambda i: (0, 0)),
                pl.BlockSpec((f, n), lambda i: (0, 0)),
                pl.BlockSpec((1, n), lambda i: (0, 0)),
            ],
            out_specs=(pl.BlockSpec((tm, f), lambda i: (i, 0)),
                       pl.BlockSpec((tm, n), lambda i: (i, 0))),
        ),
        compiler_params=pltpu.CompilerParams(
            dimension_semantics=("parallel",),
            vmem_limit_bytes=_VMEM_LIMIT),
        cost_estimate=cost,
    )(patches, w_enc, b_enc.reshape(1, f), w_dec, b_dec.reshape(1, n))


# --------------------- weight composition (trace-time, tiny) ------------------

def _encoder_matrix(params):
    """Conv2d(3,16,k=8,s=8) as a (192, 16) matrix over (kh, kw, cin) patch order."""
    w_e, b_e = params["encoder"]                          # (16, 3, 8, 8), (16,)
    w_mat = w_e.transpose(2, 3, 1, 0).reshape(8 * 8 * 3, 16)
    return w_mat.astype(jnp.float32), b_e.astype(jnp.float32)


def _compose_decoder(params):
    """Fold decoder1/2/3 (1x1 conv + PixelShuffle(2)) + final_conv into one affine
    map per encoder pixel: feat (16,) -> 8x8x3 block.  Returned as (16, 192)
    weight and (192,) bias with output column order (c, i, j) so the post-kernel
    depth-to-space moves contiguous 8-wide runs."""
    m = jnp.eye(16, dtype=jnp.float32).reshape(1, 1, 16, 16)   # M[p,q,ch,k]
    bias = jnp.zeros((1, 1, 16), jnp.float32)
    s = 1
    for name in ("decoder1", "decoder2", "decoder3"):
        w, b = params[name]                                    # (64,16,1,1), (64,)
        wr = w.reshape(16, 2, 2, 16)    # [c, i, j, m]; PixelShuffle: oc = c*4+i*2+j
        br = b.reshape(16, 2, 2)        # [c, i, j]
        m = jnp.einsum("cijm,pqmk->piqjck", wr, m).reshape(2 * s, 2 * s, 16, 16)
        bias = (jnp.einsum("cijm,pqm->piqjc", wr, bias)
                + br.transpose(1, 2, 0)[None, :, None, :, :]).reshape(2 * s, 2 * s, 16)
        s *= 2
    wf, bf = params["final_conv"]                              # (3,16,1,1), (3,)
    wfm = wf.reshape(3, 16)
    mf = jnp.einsum("cm,ijmk->ijck", wfm, m)                   # (8, 8, 3, 16)
    bias_f = jnp.einsum("cm,ijm->ijc", wfm, bias) + bf         # (8, 8, 3)
    w_dec = mf.transpose(3, 2, 0, 1).reshape(16, 192)          # (k, c, i, j)
    b_dec = bias_f.transpose(2, 0, 1).reshape(192)             # (c, i, j)
    return w_dec.astype(jnp.float32), b_dec.astype(jnp.float32)


# ------------------------------ forward ---------------------------------------

def naive_ae_3shuf_forward(params, x_nchw, returnfeat=False,
                           compute_dtype=jnp.bfloat16):
    n = x_nchw.shape[0]
    x = x_nchw.astype(jnp.float32)

    # ReflectionPad2d(4) directly in NCHW (numpy 'reflect' == torch: edge not repeated)
    padx = jnp.pad(x, ((0, 0), (0, 0), (4, 4), (4, 4)), mode="reflect")
    hp = padx.shape[2] // 8
    wp = padx.shape[3] // 8
    padx = padx[:, :, : hp * 8, : wp * 8]

    # ONE 6-D transpose: (n,3,hp,8,wp,8) -> (n,hp,wp,kh,kw,cin) patch rows.
    # The compute-dtype cast is fused into this same relayout pass.
    patches = (padx.reshape(n, 3, hp, 8, wp, 8)
                   .transpose(0, 2, 4, 3, 5, 1)
                   .reshape(n * hp * wp, 8 * 8 * 3)
                   .astype(compute_dtype))

    w_enc, b_enc = _encoder_matrix(params)      # f32
    w_dec, b_dec = _compose_decoder(params)     # f32

    if returnfeat:
        # one pallas_call, two outputs: encoder feat (M,16) + decoded blocks (M,192)
        feat_rows, blocks = _call_fused_feat(
            patches, w_enc.astype(compute_dtype), b_enc,
            w_dec.astype(compute_dtype), b_dec)
        feat = feat_rows.reshape(n, hp, wp, 16).transpose(0, 3, 1, 2)  # NCHW feat
    else:
        # whole net folded into a single (192 x 192) matmul + bias + clip
        w_full = jnp.dot(w_enc, w_dec, preferred_element_type=jnp.float32)
        b_full = jnp.dot(b_enc, w_dec, preferred_element_type=jnp.float32) + b_dec
        blocks = _call_fused(patches, w_full.astype(compute_dtype), b_full)
        feat = None

    # single depth-to-space (columns ordered c,i,j) + crop, directly to NCHW.
    rec = (blocks.reshape(n, hp, wp, 3, 8, 8)
                 .transpose(0, 3, 1, 4, 2, 5)          # n, c, hp, i, wp, j
                 .reshape(n, 3, hp * 8, wp * 8))
    refine = rec[:, :, 4:-4, 4:-4]

    # TODO(synk): `smooth_clip` is undefined in the reference source; its forward
    # is modeled as a hard clip to [-1, 1], fused into the kernel.
    if returnfeat:
        return refine, feat
    return refine


# ------------------------- pure-JAX reference (for checking) ------------------

def _reference_forward(params, x_nchw):
    x = jnp.transpose(x_nchw, (0, 2, 3, 1)).astype(jnp.float32)
    padx = jnp.pad(x, ((0, 0), (4, 4), (4, 4), (0, 0)), mode="reflect")
    n = x.shape[0]
    hp, wp = padx.shape[1] // 8, padx.shape[2] // 8
    patches = (padx.reshape(n, hp, 8, wp, 8, 3)
                   .transpose(0, 1, 3, 2, 4, 5).reshape(n, hp, wp, 192))
    w_e, b_e = params["encoder"]
    feat = patches @ w_e.transpose(2, 3, 1, 0).reshape(192, 16) + b_e

    def dec(hin, name):
        w, b = params[name]
        y = hin @ w.reshape(64, 16).T + b
        nn, hh, ww, _ = y.shape
        y = y.reshape(nn, hh, ww, 16, 2, 2).transpose(0, 1, 4, 2, 5, 3)
        return y.reshape(nn, hh * 2, ww * 2, 16)

    s = dec(dec(dec(feat, "decoder1"), "decoder2"), "decoder3")
    w_f, b_f = params["final_conv"]
    rec = s @ w_f.reshape(3, 16).T + b_f
    rec = jnp.clip(rec, -1.0, 1.0)[:, 4:-4, 4:-4, :]
    return jnp.transpose(rec, (0, 3, 1, 2)), jnp.transpose(feat, (0, 3, 1, 2))


# ------------------------------ params ----------------------------------------

def init_params(key):
    """Deterministic init mimicking PyTorch Conv2d default (uniform +/- 1/sqrt(fan_in))."""
    def conv_init(k, out_c, in_c, kh, kw):
        kw_, kb_ = jax.random.split(k)
        fan_in = in_c * kh * kw
        bound = 1.0 / (fan_in ** 0.5)
        w = jax.random.uniform(kw_, (out_c, in_c, kh, kw), jnp.float32, -bound, bound)
        b = jax.random.uniform(kb_, (out_c,), jnp.float32, -bound, bound)
        return w, b

    keys = jax.random.split(key, 5)
    return {
        "encoder": conv_init(keys[0], 16, 3, 8, 8),
        "decoder1": conv_init(keys[1], 64, 16, 1, 1),
        "decoder2": conv_init(keys[2], 64, 16, 1, 1),
        "decoder3": conv_init(keys[3], 64, 16, 1, 1),
        "final_conv": conv_init(keys[4], 3, 16, 1, 1),
    }


if __name__ == "__main__":
    key = jax.random.PRNGKey(0)
    pkey, xkey = jax.random.split(key)
    params = init_params(pkey)

    # small NCHW input consistent with the module (3 input channels)
    x = jax.random.normal(xkey, (2, 3, 16, 16), jnp.float32)

    # fully fused bf16 path (single pallas_call)
    fwd = jax.jit(functools.partial(naive_ae_3shuf_forward, params))
    out = jax.block_until_ready(fwd(x))
    assert out.shape == (2, 3, 16, 16), out.shape
    assert bool(jnp.all(jnp.isfinite(out)))
    assert bool(jnp.all(out <= 1.0)) and bool(jnp.all(out >= -1.0))

    # returnfeat path (one pallas_call, two outputs)
    fwd_feat = jax.jit(functools.partial(naive_ae_3shuf_forward, params,
                                         returnfeat=True))
    out2, feat = jax.block_until_ready(fwd_feat(x))
    assert out2.shape == (2, 3, 16, 16) and feat.shape == (2, 16, 3, 3)

    # check against a pure-JAX reference of the original sequential module
    ref_out, ref_feat = _reference_forward(params, x)
    # bf16 MXU operands (f32 accumulate) -> relaxed tolerance
    assert bool(jnp.allclose(out, ref_out, atol=2e-2)), \
        float(jnp.max(jnp.abs(out - ref_out)))
    assert bool(jnp.allclose(out2, ref_out, atol=2e-2))
    assert bool(jnp.allclose(feat, ref_feat, atol=2e-2))

    # f32 path validates the exactness of the folded-weight wiring
    fwd_f32 = jax.jit(functools.partial(naive_ae_3shuf_forward, params,
                                        compute_dtype=jnp.float32))
    out32 = jax.block_until_ready(fwd_f32(x))
    assert bool(jnp.allclose(out32, ref_out, atol=2e-3)), \
        float(jnp.max(jnp.abs(out32 - ref_out)))

    print("KERNEL_OK")
</pallas_src>

<mosaic_0001>
module attributes {stable_mosaic.version = 11 : i64} {
  func.func @_fused_kernel(%arg0: i32, %arg1: memref<16x192xbf16, #tpu.memory_space<vmem>>, %arg2: memref<192x192xbf16, #tpu.memory_space<vmem>>, %arg3: memref<1x192xf32, #tpu.memory_space<vmem>>, %arg4: memref<16x192xf32, #tpu.memory_space<vmem>>) attributes {dimension_semantics = [#tpu.dimension_semantics<parallel>], iteration_bounds = array<i64: 2>, scalar_prefetch = 0 : i64, scratch_operands = 0 : i64, tpu.core_type = #tpu.core_type<tc>, window_params = [{transform_indices = @transform_0, window_bounds = array<i64: 16, 192>}, {pipeline_mode = #tpu.pipeline_mode<synchronous>, transform_indices = @transform_1, window_bounds = array<i64: 192, 192>}, {pipeline_mode = #tpu.pipeline_mode<synchronous>, transform_indices = @transform_2, window_bounds = array<i64: 1, 192>}, {transform_indices = @transform_3, window_bounds = array<i64: 16, 192>}]} {
    %c0 = arith.constant 0 : index
    %c0_0 = arith.constant 0 : index
    %0 = vector.load %arg1[%c0, %c0_0] : memref<16x192xbf16, #tpu.memory_space<vmem>>, vector<16x192xbf16>
    %c0_1 = arith.constant 0 : index
    %c0_2 = arith.constant 0 : index
    %1 = vector.load %arg2[%c0_1, %c0_2] : memref<192x192xbf16, #tpu.memory_space<vmem>>, vector<192x192xbf16>
    %cst = arith.constant dense<0.000000e+00> : vector<16x192xf32>
    %2 = tpu.matmul %0, %1, %cst {dimension_numbers = #tpu.dot_dimension_numbers<[1], [0], [0], [1], [0, 0, 1, 1], [], []>} : vector<16x192xbf16>, vector<192x192xbf16>, vector<16x192xf32> -> vector<16x192xf32>
    %c0_3 = arith.constant 0 : index
    %c0_4 = arith.constant 0 : index
    %3 = vector.load %arg3[%c0_3, %c0_4] : memref<1x192xf32, #tpu.memory_space<vmem>>, vector<1x192xf32>
    %4 = vector.broadcast %3 : vector<1x192xf32> to vector<16x192xf32>
    %5 = arith.addf %2, %4 : vector<16x192xf32>
    %cst_5 = arith.constant -1.000000e+00 : f32
    %cst_6 = arith.constant 1.000000e+00 : f32
    %6 = vector.broadcast %cst_5 : f32 to vector<16x192xf32>
    %7 = arith.maximumf %6, %5 : vector<16x192xf32>
    %8 = vector.broadcast %cst_6 : f32 to vector<16x192xf32>
    %9 = arith.minimumf %8, %7 : vector<16x192xf32>
    %c0_7 = arith.constant 0 : index
    %c0_8 = arith.constant 0 : index
    %10 = vector.load %arg4[%c0_7, %c0_8] : memref<16x192xf32, #tpu.memory_space<vmem>>, vector<16x192xf32>
    tpu.vector_store %arg4[%c0_7, %c0_8], %9 {strides = array<i32>} : memref<16x192xf32, #tpu.memory_space<vmem>>, vector<16x192xf32>,
    return
  }
  func.func @transform_0(%arg0: i32) -> (i32, i32) {
    %c0_i32 = arith.constant 0 : i32
    %c0_i32_0 = arith.constant 0 : i32
    return %arg0, %c0_i32 : i32, i32
  }
  func.func @transform_1(%arg0: i32) -> (i32, i32) {
    %c0_i32 = arith.constant 0 : i32
    %c0_i32_0 = arith.constant 0 : i32
    %c0_i32_1 = arith.constant 0 : i32
    return %c0_i32, %c0_i32_0 : i32, i32
  }
  func.func @transform_2(%arg0: i32) -> (i32, i32) {
    %c0_i32 = arith.constant 0 : i32
    %c0_i32_0 = arith.constant 0 : i32
    %c0_i32_1 = arith.constant 0 : i32
    return %c0_i32, %c0_i32_0 : i32, i32
  }
  func.func @transform_3(%arg0: i32) -> (i32, i32) {
    %c0_i32 = arith.constant 0 : i32
    %c0_i32_0 = arith.constant 0 : i32
    return %arg0, %c0_i32 : i32, i32
  }
}

</mosaic_0001>

<bundles_post_ra>
// kernel: naive_ae_3shuf_forward.1
= control target key start
LH: loop header
LB: loop body
LE: loop exit
PB: predicated region body
PF: predicated region fallthrough
CT: control target
= control target key end

     0   :  { %s964_s12 = smov 0   ;;  %s966_s13 = smov 0   ;;  %s1219_s0 = inlined_call_operand.vmem [shape: bf16[18,192], index: 0, kind: input, shape index: {}]   ;;  %s1220_s1 = inlined_call_operand.vmem [shape: bf16[192,192], index: 1, kind: input, shape index: {}]   ;;  %s1221_s2 = inlined_call_operand.vmem [shape: f32[1,192], index: 2, kind: input, shape index: {}]   ;;  %s1222_s3 = inlined_call_operand.vmem [shape: f32[18,192], index: 3, kind: output, shape index: {}]  }
   0x1   :  { %s968_s14 = smov 0  }
   0x2 LB: > { %s977_s15 = sadd.s32 4294967295, %s910_s14   ;;  %s979_s16 = sadd.s32 1, %s910_s14   ;;  %s910_s14 = sphi %s968_s14, %s1229_s14   ;;  %s906_s13 = sphi %s966_s13, %s1228_s13   ;;  %s902_s12 = sphi %s964_s12, %s1227_s12  }
   0x3   : > { %s85_s17 = ssub.s32 %s910_s14, %s979_s16  ;;  %s88_s18 = sadd.s32 1, %s906_s13 }
   0x4   : > { %p86_p0 = scmp.eq.s32.totalorder %s85_s17, 0  ;;  %p98_p1 = scmp.ne.s32.totalorder %s906_s13, %s902_s12 }
   0x5   : > { %p99_p2 = scmp.eq.s32.totalorder %s977_s15, 1  ;;  %p602_p3 = scmp.ge.s32.totalorder %s910_s14, 1 }
   0x6   : > { %s987_s19 = scalar_select %p86_p0, %s906_s13, %s88_s18  }
   0x7   : > { %p989_p4 = por %p99_p2, %p98_p1  ;;  %p149_p5 = scmp.lt.s32.totalorder %s910_s14, 3 }
   0x9   : > { %p150_p6 = pnand %p602_p3, %p149_p5 }
   0xa   : > { %s1096_s26 = sshll.u32 (!%p150_p6), %s977_s15, 1 }
   0xb   : > { %153 = sbr.rel (%p150_p6) target bundleno = 237 (0xed), region = 32  ;;  %p184_p7 = scmp.lt.s32.totalorder (!%p150_p6), %s1096_s26, 2 }
  0x10   : > { %v673_v0 = vld [vmem:[%s1220_s1 + $0x70] sm:$0xf]  ;;  %v754_v1 = vld [vmem:[%s1220_s1 + $0x74] sm:$0xf0]  ;;  %v753_v2 = vld [vmem:[%s1220_s1 + $0x74] sm:$0xf] }
  0x11   : > { %v674_v3 = vor.u32 %v754_v1, %v673_v0  ;;  %v675_v4 = vld [vmem:[%s1220_s1 + $0x78] sm:$0xf0]  ;;  %v665_v5 = vld [vmem:[%s1220_s1 + $0x60] sm:$0xf]  ;;  %v752_v6 = vld [vmem:[%s1220_s1 + $0x64] sm:$0xf0] }
  0x12   : > { %v678_v7 = vor.u32 %v753_v2, %v675_v4  ;;  %v751_v8 = vld [vmem:[%s1220_s1 + $0x64] sm:$0xf]  ;;  %v667_v9 = vld [vmem:[%s1220_s1 + $0x68] sm:$0xf0]  ;;  %v666_v10 = vor.u32 %v752_v6, %v665_v5  ;;  %v657_v11 = vld [vmem:[%s1220_s1 + $0x50] sm:$0xf] }
  0x13   : > { %367 = vmatpush.bf16.msra.mxu0 %v674_v3  ;;  %v670_v12 = vor.u32 %v751_v8, %v667_v9  ;;  %v750_v13 = vld [vmem:[%s1220_s1 + $0x54] sm:$0xf0]  ;;  %v761_v14 = vld [vmem:[%s1220_s1 + $0xb4] sm:$0xf]  ;;  %v707_v15 = vld [vmem:[%s1220_s1 + $0xb8] sm:$0xf0] }
  0x14   : > { %395 = vmatpush.bf16.msra.mxu2 %v678_v7  ;;  %v749_v16 = vld [vmem:[%s1220_s1 + $0x54] sm:$0xf]  ;;  %v659_v17 = vld [vmem:[%s1220_s1 + $0x58] sm:$0xf0]  ;;  %v710_v18 = vor.u32 %v761_v14, %v707_v15  ;;  %v759_v19 = vld [vmem:[%s1220_s1 + $0xa4] sm:$0xf]  ;;  %v658_v21 = vor.u32 %v750_v13, %v657_v11 }
  0x15   : > { %v699_v20 = vld [vmem:[%s1220_s1 + $0xa8] sm:$0xf0]  ;;  %v705_v23 = vld [vmem:[%s1220_s1 + $0xb0] sm:$0xf]  ;;  %v762_v24 = vld [vmem:[%s1220_s1 + $0xb4] sm:$0xf0]  ;;  %v662_v25 = vor.u32 %v749_v16, %v659_v17 }
  0x16   : > { %413 = vmatpush.bf16.msra.mxu3 %v710_v18  ;;  %v702_v22 = vor.u32 %v759_v19, %v699_v20  ;;  %v649_v26 = vld [vmem:[%s1220_s1 + $0x40] sm:$0xf]  ;;  %v748_v27 = vld [vmem:[%s1220_s1 + $0x44] sm:$0xf0]  ;;  %v706_v28 = vor.u32 %v762_v24, %v705_v23  ;;  %v757_v29 = vld [vmem:[%s1220_s1 + $0x94] sm:$0xf] }
  0x17   : > { %368 = vmatpush.bf16.msra.mxu0 %v666_v10  ;;  %v747_v30 = vld [vmem:[%s1220_s1 + $0x44] sm:$0xf]  ;;  %v651_v31 = vld [vmem:[%s1220_s1 + $0x48] sm:$0xf0]  ;;  %v691_v32 = vld [vmem:[%s1220_s1 + $0x98] sm:$0xf0]  ;;  %v650_v35 = vor.u32 %v748_v27, %v649_v26 }
  0x18   : > { %396 = vmatpush.bf16.msra.mxu2 %v670_v12  ;;  %385 = vmatpush.bf16.msra.mxu1 %v706_v28  ;;  %v697_v33 = vld [vmem:[%s1220_s1 + $0xa0] sm:$0xf]  ;;  %v760_v34 = vld [vmem:[%s1220_s1 + $0xa4] sm:$0xf0]  ;;  %v641_v36 = vld [vmem:[%s1220_s1 + $0x30] sm:$0xf]  ;;  %v694_v38 = vor.u32 %v757_v29, %v691_v32  ;;  %v654_v40 = vor.u32 %v747_v30, %v651_v31 }
  0x19   : > { %v746_v37 = vld [vmem:[%s1220_s1 + $0x34] sm:$0xf0]  ;;  %v698_v39 = vor.u32 %v760_v34, %v697_v33  ;;  %v755_v41 = vld [vmem:[%s1220_s1 + $0x84] sm:$0xf]  ;;  %v683_v42 = vld [vmem:[%s1220_s1 + $0x88] sm:$0xf0] }
  0x1a   : > { %414 = vmatpush.bf16.msra.mxu3 %v702_v22  ;;  %v689_v43 = vld [vmem:[%s1220_s1 + $0x90] sm:$0xf]  ;;  %v745_v44 = vld [vmem:[%s1220_s1 + $0x34] sm:$0xf]  ;;  %v643_v45 = vld [vmem:[%s1220_s1 + $0x38] sm:$0xf0]  ;;  %v642_v48 = vor.u32 %v746_v37, %v641_v36  ;;  %v686_v49 = vor.u32 %v755_v41, %v683_v42 }
  0x1b   : > { %369 = vmatpush.bf16.msra.mxu0 %v658_v21  ;;  %v758_v46 = vld [vmem:[%s1220_s1 + $0x94] sm:$0xf0]  ;;  %v681_v50 = vld [vmem:[%s1220_s1 + $0x80] sm:$0xf]  ;;  %v756_v51 = vld [vmem:[%s1220_s1 + $0x84] sm:$0xf0]  ;;  %v646_v52 = vor.u32 %v745_v44, %v643_v45 }
  0x1c   : > { %397 = vmatpush.bf16.msra.mxu2 %v662_v25  ;;  %386 = vmatpush.bf16.msra.mxu1 %v698_v39  ;;  %v690_v47 = vor.u32 %v758_v46, %v689_v43  ;;  %v633_v53 = vld [vmem:[%s1220_s1 + $0x20] sm:$0xf]  ;;  %v744_v54 = vld [vmem:[%s1220_s1 + $0x24] sm:$0xf0]  ;;  %v743_v55 = vld [vmem:[%s1220_s1 + $0x24] sm:$0xf]  ;;  %v682_v57 = vor.u32 %v756_v51, %v681_v50 }
  0x1d   : > { %v635_v56 = vld [vmem:[%s1220_s1 + $0x28] sm:$0xf0]  ;;  %s185_s14 = scalar_select %p184_p7, %s1096_s26, 2  ;;  %v634_v58 = vor.u32 %v744_v54, %v633_v53  ;;  %v625_v59 = vld [vmem:[%s1220_s1 + $0x10] sm:$0xf]  ;;  %vm363_vm0 = vcmask 523264  }
  0x1e   : > { %415 = vmatpush.bf16.msra.mxu3 %v694_v38  ;;  %v638_v60 = vor.u32 %v743_v55, %v635_v56  ;;  %v742_v61 = vld [vmem:[%s1220_s1 + $0x14] sm:$0xf0]  ;;  %v741_v62 = vld [vmem:[%s1220_s1 + $0x14] sm:$0xf]  ;;  %v627_v63 = vld [vmem:[%s1220_s1 + $0x18] sm:$0xf0] }
  0x1f   : > { %370 = vmatpush.bf16.msra.mxu0 %v650_v35  ;;  %s736_s21 = sshll.u32 %s185_s14, 3  ;;  %v626_v3 = vor.u32 %v742_v61, %v625_v59  ;;  %v630_v4 = vor.u32 %v741_v62, %v627_v63  ;;  %v617_v5 = vld [vmem:[%s1220_s1] sm:$0xf]  ;;  %v740_v6 = vld [vmem:[%s1220_s1 + $0x4] sm:$0xf0]  ;;  %s765_s24 = sshll.u32 (%p989_p4), %s977_s15, 5 }
  0x20   : > { %398 = vmatpush.bf16.msra.mxu2 %v654_v40  ;;  %387 = vmatpush.bf16.msra.mxu1 %v690_v47  ;;  %s188_s4 = scalar_lea.vmem %s1219_s0, %s736_s21  ;;  %v739_v7 = vld [vmem:[%s1220_s1 + $0x4] sm:$0xf]  ;;  %v619_v8 = vld [vmem:[%s1220_s1 + $0x8] sm:$0xf0]  ;;  %v618_v9 = vor.u32 %v740_v6, %v617_v5  ;;  %v228_v14 = vld [vmem:[%s1221_s2] sm:$0x3]  ;;  %s1166_s28 = scalar_lea.vmem (%p989_p4), %s1222_s3, %s765_s24  }
  0x21   : > { %v737_v0 = vld [vmem:[%s188_s4 + $0x4] sm:$0xf]  ;;  %v611_v1 = vld [vmem:[%s188_s4 + $0x8] sm:$0xf0]  ;;  %v609_v10 = vld [vmem:[%s188_s4] sm:$0xf]  ;;  %v622_v12 = vor.u32 %v739_v7, %v619_v8 }
  0x22   : > { %416 = vmatpush.bf16.msra.mxu3 %v686_v49  ;;  %v614_v2 = vor.u32 %v737_v0, %v611_v1  ;;  %v738_v11 = vld [vmem:[%s188_s4 + $0x4] sm:$0xf0]  ;;  %v230_v15 = vperm.slane %v228_v14, 0  ;;  %s175_s21 = sand.u32 1, %s902_s12   ;;  %v231_v20 = vperm.slane %v228_v14, 1  ;;  %s443_s12 = ssub.s32 (%p989_p4), 3, %s1096_s26 }
  0x23   : > { %371 = vmatpush.bf16.msra.mxu0 %v642_v48  ;;  %v610_v13 = vor.u32 %v738_v11, %v609_v10  ;;  %s603_s22 = sshll.u32 %s175_s21, 5  ;;  %p444_p8 = scmp.lt.s32.totalorder (%p989_p4), %s443_s12, 2 }
  0x24   : > { %399 = vmatpush.bf16.msra.mxu2 %v646_v52  ;;  %388 = vmatpush.bf16.msra.mxu1 %v682_v57  ;;  %s1151_s23 = scalar_lea.vmem [#allocation2], %s603_s22  }
  0x25   : > { %712 = vmatmul.msk.bf16.vlgmr.msra.gmra.mxu3 %vm363_vm0, %v614_v2 }
  0x27   : > { %372 = vmatpush.bf16.msra.mxu0 %v634_v58  ;;  %711 = vmatmul.msk.bf16.vlgmr.msra.gmra.mxu1 %vm363_vm0, %v614_v2 }
  0x28   : > { %400 = vmatpush.bf16.msra.mxu2 %v638_v60 }
  0x2b   : > { %373 = vmatpush.bf16.msra.mxu0 %v626_v3 }
  0x2c   : > { %401 = vmatpush.bf16.msra.mxu2 %v630_v4 }
  0x2f   : > { %374 = vmatpush.bf16.msra.mxu0 %v618_v9 }
  0x30   : > { %402 = vmatpush.bf16.msra.mxu2 %v622_v12 }
  0x32   : > { %375 = vmatmul.bf16.vlgmr.msra.gmra.mxu0 %v610_v13 }
  0x33   : > { %403 = vmatmul.bf16.vlgmr.msra.gmra.mxu2 %v610_v13 }
  0xa4   : > { %v390_v17 = vpop.f32.mrf.mxu1 }
  0xa8   : > { %v418_v22 = vpop.f32.mrf.mxu3 }
  0xac   : > { %v392_v28 = vpop.f32.mrf.mxu1 }
  0xaf   : > { %v376_v16 = vpop.f32.mrf.mxu0 }
  0xb0   : > { %v377_v18 = vadd.f32 %v376_v16, %v230_v15  ;;  %v420_v34 = vpop.f32.mrf.mxu3 }
  0xb2   : > { %v391_v19 = vadd.f32 %v390_v17, %v377_v18 }
  0xb4   : > { %v713_v21 = vclamps-f32 %v391_v19, 1.0 }
  0xb6   : > { %431 = vst [vmem:[%s1151_s23] sm:$0xff] %v713_v21  ;;  %v404_v23 = vpop.f32.mrf.mxu2 }
  0xb7   : > { %v405_v24 = vadd.f32 %v404_v23, %v231_v20  ;;  %v378_v25 = vpop.f32.mrf.mxu0 }
  0xb8   : > { %v379_v26 = vadd.f32 %v378_v25, %v230_v15 }
  0xb9   : > { %v419_v27 = vadd.f32 %v418_v22, %v405_v24 }
  0xba   : > { %v393_v29 = vadd.f32 %v392_v28, %v379_v26 }
  0xbb   : > { %v714_v30 = vclamps-f32 %v419_v27, 1.0 }
  0xbc   : > { %v715_v31 = vclamps-f32 %v393_v29, 1.0 }
  0xbd   : > { %432 = vst.msk [vmem:[%s1151_s23 + $0x8] sm:$0xff] %vm363_vm0, %v714_v30 }
  0xbe   : > { %433 = vst [vmem:[%s1151_s23 + $0x10] sm:$0xff] %v715_v31  ;;  %v406_v32 = vpop.f32.mrf.mxu2 }
  0xbf   : > { %v407_v33 = vadd.f32 %v406_v32, %v231_v20 }
  0xc1   : > { %v421_v35 = vadd.f32 %v420_v34, %v407_v33  ;;  %441 = sbr.rel (!%p989_p4) target bundleno = 237 (0xed), region = 36 }
  0xc3   : > { %v716_v36 = vclamps-f32 %v421_v35, 1.0 }
  0xc5   : > { %434 = vst.msk [vmem:[%s1151_s23 + $0x18] sm:$0xff] %vm363_vm0, %v716_v36 }
  0xc6   : > { %s1231_s12 = smov (!%p444_p8, %s443_s12), 2 }
  0xc7   : > { %s763_s29 = sshll.u32 %s1231_s12, 4 }
  0xc8   : > { %p724_p9 = scmp.eq.s32.totalorder %s763_s29, 0 }
  0xc9   : > { %s1172_s30 = sshrl.u32 (!%p724_p9), %s1231_s12, 1 }
  0xca   : > { %454 = sbr.rel (%p724_p9) target bundleno = 237 (0xed), region = 40  ;;  %p725_p10 = scmp.le.s32.totalorder (!%p724_p9), %s1172_s30, 0 }
  0xcf   : > { %555 = sbr.rel (%p725_p10) target bundleno = 220 (0xdc), region = 88  ;;  %s1224_s15 = smov (!%p725_p10), %s1166_s28 }
  0xd0   : > { %s1225_s20 = smov (!%p725_p10), %s1151_s23  ;;  %s1181_s26 = smov (!%p725_p10), 0  }
  0xd1   : > { %s924_s4 = smov (!%p725_p10), 0  }
  0xd4 LB: >> { %v467_v37 = vld [vmem:[%s918_s20] sm:$0xff]  ;;  %v469_v38 = vld [vmem:[%s918_s20 + $0x10] sm:$0xff]  ;;  %v471_v39 = vld [vmem:[%s918_s20 + $0x8] sm:$0xff]  ;;  %s475_s5 = sadd.s32 1, %s922_s26  ;;  %s461_s4 = sadd.s32 1, %s926_s4   ;;  %s926_s4 = sphi %s924_s4, %s461_s4   ;;  %s922_s26 = sphi %s1181_s26, %s1226_s26   ;;  %s918_s20 = sphi %s1225_s20, %s480_s20   ;;  %s914_s15 = sphi %s1224_s15, %s481_s15  }
  0xd5   : >> { %468 = vst [vmem:[%s914_s15] sm:$0xff] %v467_v37  ;;  %v473_v40 = vld [vmem:[%s918_s20 + $0x18] sm:$0xff]  ;;  %p476_p11 = scmp.ge.s32.totalorder %s475_s5, %s1172_s30  ;;  %p460_p12 = scmp.ge.s32.totalorder %s461_s4, %s1172_s30 }
  0xd6   : >> { %470 = vst [vmem:[%s914_s15 + $0x10] sm:$0xff] %v469_v38 }
  0xd7   : >> { %472 = vst [vmem:[%s914_s15 + $0x8] sm:$0xff] %v471_v39  ;;  %s1233_s5 = smov (%p476_p11, %s475_s5), 0  ;;  %463 = sbr.rel (!%p460_p12) target bundleno = 212 (0xd4), region = 94 }
  0xd8   : >> { %474 = vst [vmem:[%s914_s15 + $0x18] sm:$0xff] %v473_v40  ;;  %s726_s6 = sshll.u32 %s1233_s5, 5  ;;  %s1226_s26 = smov %s1233_s5 }
  0xd9   : >> { %s480_s20 = scalar_lea.vmem %s1151_s23, %s726_s6 [#allocation2]   ;;  %s481_s15 = scalar_lea.vmem %s1166_s28, %s726_s6  }
  0xdc PF: > { %s1197_s7 = sand.u32 1, %s1231_s12   ;;  %s766_s8 = sshll.u32 %s1172_s30, 5 }
  0xdd   : > { %s1201_s9 = scalar_lea.vmem %s1151_s23, %s766_s8 [#allocation2]   ;;  %s488_s10 = scalar_lea.vmem %s1166_s28, %s766_s8  }
  0xde   : > { %p731_p13 = scmp.le.s32.totalorder %s1197_s7, 0 }
  0xdf   : > { %s928_s11 = smov (!%p731_p13), %s488_s10   ;;  %s932_s14 = smov (!%p731_p13), %s1201_s9  }
  0xe0   : > { %569 = sbr.rel (%p731_p13) target bundleno = 237 (0xed), region = 99  ;;  %s936_s17 = smov (!%p731_p13), 0  }
  0xe1   : > { %s940_s18 = smov (!%p731_p13), 0  }
  0xe5 LB: >> { %v498_v41 = vld [vmem:[%s934_s14] sm:$0xff]  ;;  %v500_v42 = vld [vmem:[%s934_s14 + $0x8] sm:$0xff]  ;;  %s502_s21 = sadd.s32 1, %s938_s17  ;;  %s492_s18 = sadd.s32 1, %s942_s18   ;;  %s942_s18 = sphi %s940_s18, %s492_s18   ;;  %s938_s17 = sphi %s936_s17, %s937_s17   ;;  %s934_s14 = sphi %s932_s14, %s507_s14   ;;  %s930_s11 = sphi %s928_s11, %s508_s11  }
  0xe6   : >> { %499 = vst [vmem:[%s930_s11] sm:$0xff] %v498_v41  ;;  %p503_p0 = scmp.ge.s32.totalorder %s502_s21, %s1197_s7  ;;  %p491_p1 = scmp.ge.s32.totalorder %s492_s18, %s1197_s7 }
  0xe7   : >> { %501 = vst [vmem:[%s930_s11 + $0x8] sm:$0xff] %v500_v42 }
  0xe8   : >> { %s1235_s21 = smov (%p503_p0, %s502_s21), 0  ;;  %494 = sbr.rel (!%p491_p1) target bundleno = 229 (0xe5), region = 105 }
  0xe9   : >> { %s732_s22 = sshll.u32 %s1235_s21, 4  ;;  %s937_s17 = smov %s1235_s21  }
  0xea   : >> { %s507_s14 = scalar_lea.vmem %s1201_s9, %s732_s22 [#allocation2]   ;;  %s508_s11 = scalar_lea.vmem %s488_s10, %s732_s22  }
  0xed PF: > { %p10_p2 = scmp.ge.s32.totalorder %s979_s16, 4   ;;  %s1227_s12 = smov %s906_s13 }
  0xee   : > { %s1228_s13 = smov %s987_s19  ;;  %s1229_s14 = smov %s979_s16 }
  0xef   :  { %12 = sbr.rel (!%p10_p2) target bundleno = 2 (0x2), region = 116 }

</bundles_post_ra>
